<compile_context>
chip_gen: v7x
topology: tpu7x:2x2x1
jax: 0.10.0
libtpu: 0.0.40
codegen_flags: <defaults>
</compile_context>

<pallas_src>
import math

import jax
import jax.numpy as jnp
from jax.experimental import pallas as pl
from jax.experimental.pallas import tpu as pltpu


def _round_up(a, b):
    return (a + b - 1) // b * b


def _fused_kernel(x_ref, w_ref, b_ref, g_ref, beta_ref, emb_ref, o_ref, hn_ref):
    # x_ref:    (tm, H)   activation row tile
    # w_ref:    (H, H)    dense weight, pre-transposed to (H_in, H_out)
    # b_ref:    (1, H)    dense bias (f32)
    # g_ref:    (1, H)    LayerNorm gamma (f32)
    # beta_ref: (1, H)    LayerNorm beta (f32)
    # emb_ref:  (H, tn)   embedding column tile (pre-transposed to (H, E_pad))
    # o_ref:    (tm, tn)  output logits tile
    # hn_ref:   (tm, H)   VMEM scratch: cached dense+gelu+LN result per row tile

    # Prologue: compute normalized hidden states only on the first vocab step
    # of each row tile; reused for every subsequent vocab tile.  This relies
    # on the vocab axis (grid axis 1) being innermost in the grid order.
    @pl.when(pl.program_id(1) == 0)
    def _compute_hidden():
        # Dense: x @ W_t + b  (MXU, f32 accumulation).
        h = jnp.dot(x_ref[...], w_ref[...], preferred_element_type=jnp.float32)
        h = h + b_ref[...].astype(jnp.float32)

        # Exact (erf-based) GELU, matching torch.nn.functional.gelu default.
        h = 0.5 * h * (1.0 + jax.lax.erf(h * (1.0 / math.sqrt(2.0))))

        # LayerNorm over hidden dim, eps=1e-12 (biased variance), in f32.
        mean = jnp.mean(h, axis=-1, keepdims=True)
        var = jnp.mean((h - mean) ** 2, axis=-1, keepdims=True)
        hn = (h - mean) * jax.lax.rsqrt(var + 1e-12)
        hn = hn * g_ref[...].astype(jnp.float32) + beta_ref[...].astype(jnp.float32)

        hn_ref[...] = hn.astype(hn_ref.dtype)

    # Inner loop body: tied generator head for this vocab tile (pure MXU).
    o_ref[...] = jnp.dot(hn_ref[...], emb_ref[...],
                         preferred_element_type=jnp.float32).astype(o_ref.dtype)


def tied_electra_generator_predictions(x, w_dense, b_dense, ln_gamma, ln_beta,
                                       embedding_weights, *, tm=512, tn=512,
                                       matmul_dtype=None, out_dtype=None,
                                       vmem_limit_bytes=64 * 1024 * 1024):
    """Fused ELECTRA tied-generator head.

    x: [B, S, H]; w_dense: [H, H] (PyTorch Linear layout [out, in]);
    b_dense/ln_gamma/ln_beta: [H]; embedding_weights: [E, H] -> logits [B, S, E].

    tm: row tile over B*S (multiple of 8).  ~1024 on v6e, ~384-512 on v7x.
    tn: vocab tile over E (multiple of 128).
    matmul_dtype: dtype of the MXU operands (default: x.dtype).  For
        production mixed precision pass jnp.bfloat16 (f32 accumulation kept).
    out_dtype: dtype of the logits (default: x.dtype).
    """
    B, S, H = x.shape
    E, He = embedding_weights.shape
    assert He == H, "embedding hidden dim must match activation hidden dim"
    M = B * S

    matmul_dtype = x.dtype if matmul_dtype is None else jnp.dtype(matmul_dtype)
    out_dtype = x.dtype if out_dtype is None else jnp.dtype(out_dtype)

    # ---- tile selection (pad instead of asserting divisibility) -------------
    # Vocab tile: multiple of 128 lanes; E padded up to a multiple of tn so the
    # output stays lane-dense even for ELECTRA's E=30522.
    tn = max(128, min(tn, _round_up(E, 128)))
    tn -= tn % 128
    E_pad = _round_up(E, tn)

    # Row tile: multiple of 8 sublanes; keep at least two row steps when M
    # allows so v7x's two TensorCores both get work (row axis is "parallel").
    tm = max(8, min(tm, _round_up(M, 8)))
    tm -= tm % 8
    if M > 8 and pl.cdiv(M, tm) < 2:
        tm = _round_up(pl.cdiv(M, 2), 8)
    M_pad = _round_up(M, tm)

    # ---- host-side operand prep ---------------------------------------------
    # TODO(synk): in production, store the tied embedding in (H, E) layout and
    # the dense weight pre-transposed (H_in, H_out) as persistent parameters so
    # these transposes/casts/pads are not paid on every forward call.
    x2 = x.reshape(M, H).astype(matmul_dtype)
    w_t = w_dense.T.astype(matmul_dtype)               # (H_in, H_out)
    emb_t = embedding_weights.T.astype(matmul_dtype)   # (H, E)
    b2 = b_dense.reshape(1, H).astype(jnp.float32)
    g2 = ln_gamma.reshape(1, H).astype(jnp.float32)
    beta2 = ln_beta.reshape(1, H).astype(jnp.float32)

    if M_pad != M:
        x2 = jnp.pad(x2, ((0, M_pad - M), (0, 0)))
    if E_pad != E:
        emb_t = jnp.pad(emb_t, ((0, 0), (0, E_pad - E)))

    grid = (M_pad // tm, E_pad // tn)

    # Advisory cost estimate: dense once per row + tied head over padded vocab;
    # embedding table is re-streamed once per row tile.
    itemsize_mm = jnp.dtype(matmul_dtype).itemsize
    cost = pl.CostEstimate(
        flops=2 * M_pad * H * H + 2 * M_pad * H * E_pad,
        transcendentals=M_pad * H,
        bytes_accessed=(M_pad * H * itemsize_mm            # activations
                        + H * H * itemsize_mm              # dense weight
                        + grid[0] * H * E_pad * itemsize_mm  # emb re-streams
                        + M_pad * E_pad * jnp.dtype(out_dtype).itemsize),  # logits
    )

    def _run(single_buffer_resident):
        # Resident operands (constant index_map) don't need double buffers.
        resident = ({"pipeline_mode": pl.Buffered(1)}
                    if single_buffer_resident else {})
        in_specs = [
            pl.BlockSpec((tm, H), lambda i, j: (i, 0)),              # x row tile
            pl.BlockSpec((H, H), lambda i, j: (0, 0), **resident),   # dense W
            pl.BlockSpec((1, H), lambda i, j: (0, 0), **resident),   # dense bias
            pl.BlockSpec((1, H), lambda i, j: (0, 0), **resident),   # LN gamma
            pl.BlockSpec((1, H), lambda i, j: (0, 0), **resident),   # LN beta
            pl.BlockSpec((H, tn), lambda i, j: (0, j)),              # emb col tile
        ]
        return pl.pallas_call(
            _fused_kernel,
            out_shape=jax.ShapeDtypeStruct((M_pad, E_pad), out_dtype),
            grid_spec=pltpu.PrefetchScalarGridSpec(
                num_scalar_prefetch=0,
                grid=grid,
                in_specs=in_specs,
                out_specs=pl.BlockSpec((tm, tn), lambda i, j: (i, j)),
                scratch_shapes=[pltpu.VMEM((tm, H), matmul_dtype)],
            ),
            compiler_params=pltpu.CompilerParams(
                dimension_semantics=("parallel", "arbitrary"),
                vmem_limit_bytes=vmem_limit_bytes),
            cost_estimate=cost,
        )(x2, w_t, b2, g2, beta2, emb_t)

    try:
        out = _run(True)
    except Exception:
        # pipeline_mode=pl.Buffered(1) unsupported on this jax version; fall
        # back to default double buffering (correctness unaffected).
        out = _run(False)

    return out[:M, :E].reshape(B, S, E)


def _reference(x, w_dense, b_dense, ln_gamma, ln_beta, emb):
    h = jnp.einsum('bsh,oh->bso', x, w_dense) + b_dense
    h = 0.5 * h * (1.0 + jax.lax.erf(h / jnp.sqrt(2.0)))
    mean = jnp.mean(h, axis=-1, keepdims=True)
    var = jnp.mean((h - mean) ** 2, axis=-1, keepdims=True)
    h = (h - mean) / jnp.sqrt(var + 1e-12) * ln_gamma + ln_beta
    return jnp.einsum('bsh,eh->bse', h, emb)


if __name__ == "__main__":
    B, S, H, E = 2, 8, 32, 64  # batch, seq, hidden_size, vocab_size

    key = jax.random.PRNGKey(0)
    k1, k2, k3, k4, k5, k6 = jax.random.split(key, 6)

    x = jax.random.normal(k1, (B, S, H), dtype=jnp.float32)
    w_dense = jax.random.normal(k2, (H, H), dtype=jnp.float32) * (1.0 / math.sqrt(H))
    b_dense = jax.random.normal(k3, (H,), dtype=jnp.float32) * 0.02
    ln_gamma = (jnp.ones((H,), dtype=jnp.float32)
                + 0.1 * jax.random.normal(k4, (H,), dtype=jnp.float32))
    ln_beta = 0.1 * jax.random.normal(k5, (H,), dtype=jnp.float32)
    emb = jax.random.normal(k6, (E, H), dtype=jnp.float32) * 0.02

    ref = _reference(x, w_dense, b_dense, ln_gamma, ln_beta, emb)

    # Full-precision path (matches the PyTorch reference numerics).
    logits = tied_electra_generator_predictions(
        x, w_dense, b_dense, ln_gamma, ln_beta, emb)
    logits = jax.block_until_ready(logits)
    assert logits.shape == (B, S, E)
    assert jnp.allclose(logits, ref, atol=1e-4, rtol=1e-4), "f32 mismatch vs reference"

    # Mixed-precision production path: bf16 MXU operands + bf16 logits,
    # f32 accumulation (looser tolerance, standard mixed precision).
    logits_bf16 = tied_electra_generator_predictions(
        x, w_dense, b_dense, ln_gamma, ln_beta, emb,
        matmul_dtype=jnp.bfloat16, out_dtype=jnp.bfloat16)
    logits_bf16 = jax.block_until_ready(logits_bf16)
    assert logits_bf16.shape == (B, S, E)
    assert jnp.allclose(logits_bf16.astype(jnp.float32), ref,
                        atol=3e-2, rtol=5e-2), "bf16 mismatch vs reference"

    print("KERNEL_OK")
</pallas_src>

<mosaic_0001>
module attributes {stable_mosaic.version = 11 : i64} {
  func.func @_fused_kernel(%arg0: i32, %arg1: i32, %arg2: memref<8x32xf32, #tpu.memory_space<vmem>>, %arg3: memref<32x32xf32, #tpu.memory_space<vmem>>, %arg4: memref<1x32xf32, #tpu.memory_space<vmem>>, %arg5: memref<1x32xf32, #tpu.memory_space<vmem>>, %arg6: memref<1x32xf32, #tpu.memory_space<vmem>>, %arg7: memref<32x128xf32, #tpu.memory_space<vmem>>, %arg8: memref<8x128xf32, #tpu.memory_space<vmem>>, %arg9: memref<8x32xf32, #tpu.memory_space<vmem>>) attributes {dimension_semantics = [#tpu.dimension_semantics<parallel>, #tpu.dimension_semantics<arbitrary>], iteration_bounds = array<i64: 2, 1>, scalar_prefetch = 0 : i64, scratch_operands = 1 : i64, tpu.core_type = #tpu.core_type<tc>, window_params = [{transform_indices = @transform_0, window_bounds = array<i64: 8, 32>}, {pipeline_mode = #tpu.pipeline_mode<synchronous>, transform_indices = @transform_1, window_bounds = array<i64: 32, 32>}, {pipeline_mode = #tpu.pipeline_mode<synchronous>, transform_indices = @transform_2, window_bounds = array<i64: 1, 32>}, {pipeline_mode = #tpu.pipeline_mode<synchronous>, transform_indices = @transform_3, window_bounds = array<i64: 1, 32>}, {pipeline_mode = #tpu.pipeline_mode<synchronous>, transform_indices = @transform_4, window_bounds = array<i64: 1, 32>}, {transform_indices = @transform_5, window_bounds = array<i64: 32, 128>}, {transform_indices = @transform_6, window_bounds = array<i64: 8, 128>}]} {
    %c0_i32 = arith.constant 0 : i32
    %0 = arith.cmpi eq, %arg1, %c0_i32 : i32
    %1 = arith.extui %0 : i1 to i32
    %c0_i32_0 = arith.constant 0 : i32
    %2 = arith.cmpi ne, %1, %c0_i32_0 : i32
    scf.if %2 {
      %c0_6 = arith.constant 0 : index
      %c0_7 = arith.constant 0 : index
      %7 = vector.load %arg2[%c0_6, %c0_7] : memref<8x32xf32, #tpu.memory_space<vmem>>, vector<8x32xf32>
      %c0_8 = arith.constant 0 : index
      %c0_9 = arith.constant 0 : index
      %8 = vector.load %arg3[%c0_8, %c0_9] : memref<32x32xf32, #tpu.memory_space<vmem>>, vector<32x32xf32>
      %cst_10 = arith.constant dense<0.000000e+00> : vector<8x32xf32>
      %9 = tpu.matmul %7, %8, %cst_10 {dimension_numbers = #tpu.dot_dimension_numbers<[1], [0], [0], [1], [0, 0, 1, 1], [], []>} : vector<8x32xf32>, vector<32x32xf32>, vector<8x32xf32> -> vector<8x32xf32>
      %c0_11 = arith.constant 0 : index
      %c0_12 = arith.constant 0 : index
      %10 = vector.load %arg4[%c0_11, %c0_12] : memref<1x32xf32, #tpu.memory_space<vmem>>, vector<1x32xf32>
      %11 = vector.broadcast %10 : vector<1x32xf32> to vector<8x32xf32>
      %12 = arith.addf %9, %11 : vector<8x32xf32>
      %cst_13 = arith.constant 5.000000e-01 : f32
      %13 = vector.broadcast %cst_13 : f32 to vector<8x32xf32>
      %14 = arith.mulf %13, %12 : vector<8x32xf32>
      %cst_14 = arith.constant 0.707106769 : f32
      %15 = vector.broadcast %cst_14 : f32 to vector<8x32xf32>
      %16 = arith.mulf %12, %15 : vector<8x32xf32>
      %17 = math.erf %16 : vector<8x32xf32>
      %cst_15 = arith.constant 1.000000e+00 : f32
      %18 = vector.broadcast %cst_15 : f32 to vector<8x32xf32>
      %19 = arith.addf %18, %17 : vector<8x32xf32>
      %20 = arith.mulf %14, %19 : vector<8x32xf32>
      %cst_16 = arith.constant dense<0.000000e+00> : vector<8xf32>
      %21 = vector.multi_reduction <add>, %20, %cst_16 [1] : vector<8x32xf32> to vector<8xf32>
      %22 = vector.shape_cast %21 : vector<8xf32> to vector<8x1xf32>
      %cst_17 = arith.constant 3.200000e+01 : f32
      %23 = vector.broadcast %cst_17 : f32 to vector<8x1xf32>
      %24 = arith.divf %22, %23 : vector<8x1xf32>
      %25 = vector.broadcast %24 : vector<8x1xf32> to vector<8x32xf32>
      %26 = arith.subf %20, %25 : vector<8x32xf32>
      %27 = arith.mulf %26, %26 : vector<8x32xf32>
      %cst_18 = arith.constant dense<0.000000e+00> : vector<8xf32>
      %28 = vector.multi_reduction <add>, %27, %cst_18 [1] : vector<8x32xf32> to vector<8xf32>
      %29 = vector.shape_cast %28 : vector<8xf32> to vector<8x1xf32>
      %cst_19 = arith.constant 3.200000e+01 : f32
      %30 = vector.broadcast %cst_19 : f32 to vector<8x1xf32>
      %31 = arith.divf %29, %30 : vector<8x1xf32>
      %32 = vector.broadcast %24 : vector<8x1xf32> to vector<8x32xf32>
      %33 = arith.subf %20, %32 : vector<8x32xf32>
      %cst_20 = arith.constant 9.99999996E-13 : f32
      %34 = vector.broadcast %cst_20 : f32 to vector<8x1xf32>
      %35 = arith.addf %31, %34 : vector<8x1xf32>
      %36 = math.rsqrt %35 : vector<8x1xf32>
      %37 = vector.broadcast %36 : vector<8x1xf32> to vector<8x32xf32>
      %38 = arith.mulf %33, %37 : vector<8x32xf32>
      %c0_21 = arith.constant 0 : index
      %c0_22 = arith.constant 0 : index
      %39 = vector.load %arg5[%c0_21, %c0_22] : memref<1x32xf32, #tpu.memory_space<vmem>>, vector<1x32xf32>
      %40 = vector.broadcast %39 : vector<1x32xf32> to vector<8x32xf32>
      %41 = arith.mulf %38, %40 : vector<8x32xf32>
      %c0_23 = arith.constant 0 : index
      %c0_24 = arith.constant 0 : index
      %42 = vector.load %arg6[%c0_23, %c0_24] : memref<1x32xf32, #tpu.memory_space<vmem>>, vector<1x32xf32>
      %43 = vector.broadcast %42 : vector<1x32xf32> to vector<8x32xf32>
      %44 = arith.addf %41, %43 : vector<8x32xf32>
      %c0_25 = arith.constant 0 : index
      %c0_26 = arith.constant 0 : index
      %45 = vector.load %arg9[%c0_25, %c0_26] : memref<8x32xf32, #tpu.memory_space<vmem>>, vector<8x32xf32>
      tpu.vector_store %arg9[%c0_25, %c0_26], %44 {strides = array<i32>} : memref<8x32xf32, #tpu.memory_space<vmem>>, vector<8x32xf32>,
    } else {
    }
    %c0 = arith.constant 0 : index
    %c0_1 = arith.constant 0 : index
    %3 = vector.load %arg9[%c0, %c0_1] : memref<8x32xf32, #tpu.memory_space<vmem>>, vector<8x32xf32>
    %c0_2 = arith.constant 0 : index
    %c0_3 = arith.constant 0 : index
    %4 = vector.load %arg7[%c0_2, %c0_3] : memref<32x128xf32, #tpu.memory_space<vmem>>, vector<32x128xf32>
    %cst = arith.constant dense<0.000000e+00> : vector<8x128xf32>
    %5 = tpu.matmul %3, %4, %cst {dimension_numbers = #tpu.dot_dimension_numbers<[1], [0], [0], [1], [0, 0, 1, 1], [], []>} : vector<8x32xf32>, vector<32x128xf32>, vector<8x128xf32> -> vector<8x128xf32>
    %c0_4 = arith.constant 0 : index
    %c0_5 = arith.constant 0 : index
    %6 = vector.load %arg8[%c0_4, %c0_5] : memref<8x128xf32, #tpu.memory_space<vmem>>, vector<8x128xf32>
    tpu.vector_store %arg8[%c0_4, %c0_5], %5 {strides = array<i32>} : memref<8x128xf32, #tpu.memory_space<vmem>>, vector<8x128xf32>,
    return
  }
  func.func @transform_0(%arg0: i32, %arg1: i32) -> (i32, i32) {
    %c0_i32 = arith.constant 0 : i32
    %c0_i32_0 = arith.constant 0 : i32
    return %arg0, %c0_i32 : i32, i32
  }
  func.func @transform_1(%arg0: i32, %arg1: i32) -> (i32, i32) {
    %c0_i32 = arith.constant 0 : i32
    %c0_i32_0 = arith.constant 0 : i32
    %c0_i32_1 = arith.constant 0 : i32
    return %c0_i32, %c0_i32_0 : i32, i32
  }
  func.func @transform_2(%arg0: i32, %arg1: i32) -> (i32, i32) {
    %c0_i32 = arith.constant 0 : i32
    %c0_i32_0 = arith.constant 0 : i32
    %c0_i32_1 = arith.constant 0 : i32
    return %c0_i32, %c0_i32_0 : i32, i32
  }
  func.func @transform_3(%arg0: i32, %arg1: i32) -> (i32, i32) {
    %c0_i32 = arith.constant 0 : i32
    %c0_i32_0 = arith.constant 0 : i32
    %c0_i32_1 = arith.constant 0 : i32
    return %c0_i32, %c0_i32_0 : i32, i32
  }
  func.func @transform_4(%arg0: i32, %arg1: i32) -> (i32, i32) {
    %c0_i32 = arith.constant 0 : i32
    %c0_i32_0 = arith.constant 0 : i32
    %c0_i32_1 = arith.constant 0 : i32
    return %c0_i32, %c0_i32_0 : i32, i32
  }
  func.func @transform_5(%arg0: i32, %arg1: i32) -> (i32, i32) {
    %c0_i32 = arith.constant 0 : i32
    %c0_i32_0 = arith.constant 0 : i32
    return %c0_i32, %arg1 : i32, i32
  }
  func.func @transform_6(%arg0: i32, %arg1: i32) -> (i32, i32) {
    %c0_i32 = arith.constant 0 : i32
    return %arg0, %arg1 : i32, i32
  }
}

module attributes {stable_mosaic.version = 11 : i64} {
  func.func @_fused_kernel(%arg0: i32, %arg1: i32, %arg2: memref<8x32xf32, #tpu.memory_space<vmem>>, %arg3: memref<32x32xf32, #tpu.memory_space<vmem>>, %arg4: memref<1x32xf32, #tpu.memory_space<vmem>>, %arg5: memref<1x32xf32, #tpu.memory_space<vmem>>, %arg6: memref<1x32xf32, #tpu.memory_space<vmem>>, %arg7: memref<32x128xf32, #tpu.memory_space<vmem>>, %arg8: memref<8x128xf32, #tpu.memory_space<vmem>>, %arg9: memref<8x32xf32, #tpu.memory_space<vmem>>) attributes {dimension_semantics = [#tpu.dimension_semantics<parallel>, #tpu.dimension_semantics<arbitrary>], iteration_bounds = array<i64: 2, 1>, scalar_prefetch = 0 : i64, scratch_operands = 1 : i64, tpu.core_type = #tpu.core_type<tc>, window_params = [{transform_indices = @transform_0, window_bounds = array<i64: 8, 32>}, {pipeline_mode = #tpu.pipeline_mode<synchronous>, transform_indices = @transform_1, window_bounds = array<i64: 32, 32>}, {pipeline_mode = #tpu.pipeline_mode<synchronous>, transform_indices = @transform_2, window_bounds = array<i64: 1, 32>}, {pipeline_mode = #tpu.pipeline_mode<synchronous>, transform_indices = @transform_3, window_bounds = array<i64: 1, 32>}, {pipeline_mode = #tpu.pipeline_mode<synchronous>, transform_indices = @transform_4, window_bounds = array<i64: 1, 32>}, {transform_indices = @transform_5, window_bounds = array<i64: 32, 128>}, {transform_indices = @transform_6, window_bounds = array<i64: 8, 128>}]} {
    %c0_i32 = arith.constant 0 : i32
    %0 = arith.cmpi eq, %arg1, %c0_i32 : i32
    %1 = arith.extui %0 : i1 to i32
    %c0_i32_0 = arith.constant 0 : i32
    %2 = arith.cmpi ne, %1, %c0_i32_0 : i32
    scf.if %2 {
      %c0_6 = arith.constant 0 : index
      %c0_7 = arith.constant 0 : index
      %7 = vector.load %arg2[%c0_6, %c0_7] : memref<8x32xf32, #tpu.memory_space<vmem>>, vector<8x32xf32>
      %c0_8 = arith.constant 0 : index
      %c0_9 = arith.constant 0 : index
      %8 = vector.load %arg3[%c0_8, %c0_9] : memref<32x32xf32, #tpu.memory_space<vmem>>, vector<32x32xf32>
      %cst_10 = arith.constant dense<0.000000e+00> : vector<8x32xf32>
      %9 = tpu.matmul %7, %8, %cst_10 {dimension_numbers = #tpu.dot_dimension_numbers<[1], [0], [0], [1], [0, 0, 1, 1], [], []>} : vector<8x32xf32>, vector<32x32xf32>, vector<8x32xf32> -> vector<8x32xf32>
      %c0_11 = arith.constant 0 : index
      %c0_12 = arith.constant 0 : index
      %10 = vector.load %arg4[%c0_11, %c0_12] : memref<1x32xf32, #tpu.memory_space<vmem>>, vector<1x32xf32>
      %11 = vector.broadcast %10 : vector<1x32xf32> to vector<8x32xf32>
      %12 = arith.addf %9, %11 : vector<8x32xf32>
      %cst_13 = arith.constant 5.000000e-01 : f32
      %13 = vector.broadcast %cst_13 : f32 to vector<8x32xf32>
      %14 = arith.mulf %13, %12 : vector<8x32xf32>
      %cst_14 = arith.constant 0.707106769 : f32
      %15 = vector.broadcast %cst_14 : f32 to vector<8x32xf32>
      %16 = arith.mulf %12, %15 : vector<8x32xf32>
      %17 = math.erf %16 : vector<8x32xf32>
      %cst_15 = arith.constant 1.000000e+00 : f32
      %18 = vector.broadcast %cst_15 : f32 to vector<8x32xf32>
      %19 = arith.addf %18, %17 : vector<8x32xf32>
      %20 = arith.mulf %14, %19 : vector<8x32xf32>
      %cst_16 = arith.constant dense<0.000000e+00> : vector<8xf32>
      %21 = vector.multi_reduction <add>, %20, %cst_16 [1] : vector<8x32xf32> to vector<8xf32>
      %22 = vector.shape_cast %21 : vector<8xf32> to vector<8x1xf32>
      %cst_17 = arith.constant 3.200000e+01 : f32
      %23 = vector.broadcast %cst_17 : f32 to vector<8x1xf32>
      %24 = arith.divf %22, %23 : vector<8x1xf32>
      %25 = vector.broadcast %24 : vector<8x1xf32> to vector<8x32xf32>
      %26 = arith.subf %20, %25 : vector<8x32xf32>
      %27 = arith.mulf %26, %26 : vector<8x32xf32>
      %cst_18 = arith.constant dense<0.000000e+00> : vector<8xf32>
      %28 = vector.multi_reduction <add>, %27, %cst_18 [1] : vector<8x32xf32> to vector<8xf32>
      %29 = vector.shape_cast %28 : vector<8xf32> to vector<8x1xf32>
      %cst_19 = arith.constant 3.200000e+01 : f32
      %30 = vector.broadcast %cst_19 : f32 to vector<8x1xf32>
      %31 = arith.divf %29, %30 : vector<8x1xf32>
      %32 = vector.broadcast %24 : vector<8x1xf32> to vector<8x32xf32>
      %33 = arith.subf %20, %32 : vector<8x32xf32>
      %cst_20 = arith.constant 9.99999996E-13 : f32
      %34 = vector.broadcast %cst_20 : f32 to vector<8x1xf32>
      %35 = arith.addf %31, %34 : vector<8x1xf32>
      %36 = math.rsqrt %35 : vector<8x1xf32>
      %37 = vector.broadcast %36 : vector<8x1xf32> to vector<8x32xf32>
      %38 = arith.mulf %33, %37 : vector<8x32xf32>
      %c0_21 = arith.constant 0 : index
      %c0_22 = arith.constant 0 : index
      %39 = vector.load %arg5[%c0_21, %c0_22] : memref<1x32xf32, #tpu.memory_space<vmem>>, vector<1x32xf32>
      %40 = vector.broadcast %39 : vector<1x32xf32> to vector<8x32xf32>
      %41 = arith.mulf %38, %40 : vector<8x32xf32>
      %c0_23 = arith.constant 0 : index
      %c0_24 = arith.constant 0 : index
      %42 = vector.load %arg6[%c0_23, %c0_24] : memref<1x32xf32, #tpu.memory_space<vmem>>, vector<1x32xf32>
      %43 = vector.broadcast %42 : vector<1x32xf32> to vector<8x32xf32>
      %44 = arith.addf %41, %43 : vector<8x32xf32>
      %c0_25 = arith.constant 0 : index
      %c0_26 = arith.constant 0 : index
      %45 = vector.load %arg9[%c0_25, %c0_26] : memref<8x32xf32, #tpu.memory_space<vmem>>, vector<8x32xf32>
      tpu.vector_store %arg9[%c0_25, %c0_26], %44 {strides = array<i32>} : memref<8x32xf32, #tpu.memory_space<vmem>>, vector<8x32xf32>,
    } else {
    }
    %c0 = arith.constant 0 : index
    %c0_1 = arith.constant 0 : index
    %3 = vector.load %arg9[%c0, %c0_1] : memref<8x32xf32, #tpu.memory_space<vmem>>, vector<8x32xf32>
    %c0_2 = arith.constant 0 : index
    %c0_3 = arith.constant 0 : index
    %4 = vector.load %arg7[%c0_2, %c0_3] : memref<32x128xf32, #tpu.memory_space<vmem>>, vector<32x128xf32>
    %cst = arith.constant dense<0.000000e+00> : vector<8x128xf32>
    %5 = tpu.matmul %3, %4, %cst {dimension_numbers = #tpu.dot_dimension_numbers<[1], [0], [0], [1], [0, 0, 1, 1], [], []>} : vector<8x32xf32>, vector<32x128xf32>, vector<8x128xf32> -> vector<8x128xf32>
    %c0_4 = arith.constant 0 : index
    %c0_5 = arith.constant 0 : index
    %6 = vector.load %arg8[%c0_4, %c0_5] : memref<8x128xf32, #tpu.memory_space<vmem>>, vector<8x128xf32>
    tpu.vector_store %arg8[%c0_4, %c0_5], %5 {strides = array<i32>} : memref<8x128xf32, #tpu.memory_space<vmem>>, vector<8x128xf32>,
    return
  }
  func.func @transform_0(%arg0: i32, %arg1: i32) -> (i32, i32) {
    %c0_i32 = arith.constant 0 : i32
    %c0_i32_0 = arith.constant 0 : i32
    return %arg0, %c0_i32 : i32, i32
  }
  func.func @transform_1(%arg0: i32, %arg1: i32) -> (i32, i32) {
    %c0_i32 = arith.constant 0 : i32
    %c0_i32_0 = arith.constant 0 : i32
    %c0_i32_1 = arith.constant 0 : i32
    return %c0_i32, %c0_i32_0 : i32, i32
  }
  func.func @transform_2(%arg0: i32, %arg1: i32) -> (i32, i32) {
    %c0_i32 = arith.constant 0 : i32
    %c0_i32_0 = arith.constant 0 : i32
    %c0_i32_1 = arith.constant 0 : i32
    return %c0_i32, %c0_i32_0 : i32, i32
  }
  func.func @transform_3(%arg0: i32, %arg1: i32) -> (i32, i32) {
    %c0_i32 = arith.constant 0 : i32
    %c0_i32_0 = arith.constant 0 : i32
    %c0_i32_1 = arith.constant 0 : i32
    return %c0_i32, %c0_i32_0 : i32, i32
  }
  func.func @transform_4(%arg0: i32, %arg1: i32) -> (i32, i32) {
    %c0_i32 = arith.constant 0 : i32
    %c0_i32_0 = arith.constant 0 : i32
    %c0_i32_1 = arith.constant 0 : i32
    return %c0_i32, %c0_i32_0 : i32, i32
  }
  func.func @transform_5(%arg0: i32, %arg1: i32) -> (i32, i32) {
    %c0_i32 = arith.constant 0 : i32
    %c0_i32_0 = arith.constant 0 : i32
    return %c0_i32, %arg1 : i32, i32
  }
  func.func @transform_6(%arg0: i32, %arg1: i32) -> (i32, i32) {
    %c0_i32 = arith.constant 0 : i32
    return %arg0, %arg1 : i32, i32
  }
}

</mosaic_0001>

<bundles_post_ra>
// kernel: tpu_custom_call.1
= control target key start
LH: loop header
LB: loop body
LE: loop exit
PB: predicated region body
PF: predicated region fallthrough
CT: control target
= control target key end

     0   :  { %s1545_s0 = inlined_call_operand.hbm [shape: f32[16,32], index: 0, kind: input, shape index: {}]   ;;  %s1546_s1 = inlined_call_operand.hbm [shape: f32[32,32], index: 1, kind: input, shape index: {}]   ;;  %s1547_s2 = inlined_call_operand.hbm [shape: f32[1,32], index: 2, kind: input, shape index: {}]   ;;  %s1548_s3 = inlined_call_operand.hbm [shape: f32[1,32], index: 3, kind: input, shape index: {}]   ;;  %s1549_s4 = inlined_call_operand.hbm [shape: f32[1,32], index: 4, kind: input, shape index: {}]   ;;  %s1550_s5 = inlined_call_operand.hbm [shape: f32[32,128], index: 5, kind: input, shape index: {}]   ;;  %s1551_s6 = inlined_call_operand.hbm [shape: f32[16,128], index: 6, kind: output, shape index: {}]  }
   0x1   :  { %1558 = sst [smem:[#allocation20_spill]] %s1546_s1 }
   0x2   :  { %11 = vsyncpa [#allocation4], 0 }
   0x3   :  { %13 = vsyncpa [#allocation4 + $0x1], 0 }
   0x4   :  { %14 = vsyncpa [#allocation7], 0 }
   0x5   :  { %15 = vsyncpa [#allocation10], 0 }
   0x6   :  { %16 = vsyncpa [#allocation13], 0 }
   0x7   :  { %17 = vsyncpa [#allocation5], 0 }
   0x8   :  { %19 = vsyncpa [#allocation5 + $0x1], 0  ;;  %s1212_s21 = smov 0   ;;  %s1214_s22 = smov 0  }
   0x9   :  { %s1216_s23 = smov 0   ;;  %s1218_s24 = smov 0  }
   0xa   :  { %s1220_s25 = smov 0   ;;  %s1222_s26 = smov 0  }
   0xb LB: > { %s1552_s27 = sadd.s32 4294967295, %s1163_s26   ;;  %p707_p0 = scmp.ge.s32.totalorder %s1163_s26, 1  ;;  %s1163_s26 = sphi %s1222_s26, %s25_s26   ;;  %s1159_s25 = sphi %s1220_s25, %s1581_s25   ;;  %s1155_s24 = sphi %s1218_s24, %s1580_s24   ;;  %s1151_s23 = sphi %s1216_s23, %s1579_s23   ;;  %s1147_s22 = sphi %s1214_s22, %s1578_s22   ;;  %s1143_s21 = sphi %s1212_s21, %s1577_s21  }
   0xc   : > { %p1246_p1 = scmp.eq.s32.totalorder %s1552_s27, 0  ;;  %p206_p2 = scmp.lt.s32.totalorder %s1163_s26, 3 }
   0xd   : > { %s1165_s30 = smov [#allocation6]   ;;  %s1166_s9 = smov [#allocation9]  }
   0xe   : > { %s1559_s28 = scalar_select %p1246_p1, 1, 0 }
   0xf   : > { %p1251_p3 = pnand %p707_p0, %p206_p2  ;;  %s218_s7 = sshll.u32 %s1165_s30, 4  ;;  %s1255_s7 = int_to_ptr.vmem [resolvable:$true] %s218_s7 }
  0x10   : > { %s243_s10 = sshll.u32 %s1166_s9, 4  ;;  %s1167_s11 = smov [#allocation8]   ;;  %s1266_s10 = int_to_ptr.vmem [resolvable:$true] %s243_s10 }
  0x11   : > { %s1560_s29 = scalar_select %p1251_p3, 1, 0 }
  0x12   : > { %p801_p4 = pneg %p1251_p3  ;;  %s1268_s12 = sshll.u32 %s1167_s11, 4  ;;  %s233_s12 = int_to_ptr.vmem [resolvable:$true] %s1268_s12 }
  0x13   : > { %s1562_s1 = sld [smem:[#allocation20_spill]] }
  0x14   : > { %p1262_p6 = pnand %p801_p4, %p1246_p1 }
  0x16   : > { %p1278_p8 = pneg %p1262_p6 }
  0x19   : > { %s899_s15 = scalar_lea.hbm %s1562_s1, 512 }
  0x1a   : > { %p900_p7 = scmp.ne.s32.totalorder %s1562_s1, %s899_s15  ;;  %p906_p11 = scmp.lt.u32.totalorder %s899_s15, %s1562_s1 }
  0x1c   : > { %p902_p9 = pnand %p1278_p8, %p900_p7 }
  0x1e   : > { %p903_p10 = pneg %p902_p9 }
  0x20   : > { %p908_p12 = pnand %p906_p11, %p903_p10 }
  0x22   : > { %911 = shalt.err (!%p908_p12)
}
  0x23   : > { %s912_s30 = scalar_lea.vmem %s1255_s7, 512  ;;  %p920_p4 = scmp.lt.s32.totalorder %s1255_s7, %s1255_s7 }
  0x24   : > { %p913_p13 = scmp.ne.s32.totalorder %s1255_s7, %s912_s30  ;;  %p921_p5 = scmp.lt.s32.totalorder %s912_s30, %s912_s30 }
  0x26   : > { %p915_p0 = pnand %p913_p13, %p1278_p8  ;;  %p922_p7 = por %p921_p5, %p920_p4 }
  0x28   : > { %p916_p2 = pneg %p915_p0 }
  0x2a   : > { %p923_p9 = pnand %p922_p7, %p916_p2 }
  0x2c   : > { %926 = shalt.err (!%p923_p9)
}
  0x2d   : > { %s1556_s9 = smov 128   ;;  %s1169_s11 = smov 8  }
  0x2e   : > { %804 = dma.hbm_to_vmem [thread:$0]  (!%p1262_p6), %s1562_s1, 512, %s1255_s7, [#allocation7], %s1556_s9, %s1556_s9, %s1169_s11  }
  0x2f   : > { %s927_s17 = scalar_lea.hbm %s1548_s3, 16 }
  0x30   : > { %p928_p5 = scmp.ne.s32.totalorder %s1548_s3, %s927_s17  ;;  %p934_p12 = scmp.lt.u32.totalorder %s927_s17, %s1548_s3 }
  0x32   : > { %p930_p10 = pnand %p928_p5, %p1278_p8 }
  0x34   : > { %p931_p11 = pneg %p930_p10 }
  0x36   : > { %p936_p13 = pnand %p934_p12, %p931_p11 }
  0x38   : > { %939 = shalt.err (!%p936_p13)
}
  0x39   : > { %s940_s7 = scalar_lea.vmem %s1266_s10, 16  ;;  %s947_s13 = scalar_lea.vmem %s1266_s10, 32 }
  0x3a   : > { %p941_p0 = scmp.ne.s32.totalorder %s1266_s10, %s940_s7  ;;  %p948_p7 = scmp.lt.s32.totalorder %s1266_s10, %s1266_s10 }
  0x3b   : > { %p949_p9 = scmp.lt.s32.totalorder %s947_s13, %s940_s7 }
  0x3c   : > { %p943_p2 = pnand %p941_p0, %p1278_p8 }
  0x3d   : > { %p950_p5 = por %p949_p9, %p948_p7 }
  0x3e   : > { %p944_p4 = pneg %p943_p2 }
  0x40   : > { %p951_p10 = pnand %p950_p5, %p944_p4 }
  0x42   : > { %954 = shalt.err (!%p951_p10)
}
  0x43   : > { %810 = dma.hbm_to_vmem [thread:$0]  (!%p1262_p6), %s1548_s3, 16, %s1266_s10, [#allocation10]  }
  0x44   : > { %s955_s17 = scalar_lea.hbm %s1547_s2, 16 }
  0x45   : > { %p956_p11 = scmp.ne.s32.totalorder %s1547_s2, %s955_s17  ;;  %p962_p0 = scmp.lt.u32.totalorder %s955_s17, %s1547_s2 }
  0x47   : > { %p958_p12 = pnand %p956_p11, %p1278_p8 }
  0x49   : > { %p959_p13 = pneg %p958_p12 }
  0x4b   : > { %p964_p2 = pnand %p962_p0, %p959_p13 }
  0x4d   : > { %967 = shalt.err (!%p964_p2)
}
  0x4e   : > { %s968_s13 = scalar_lea.vmem %s233_s12, 16  ;;  %s975_s10 = scalar_lea.vmem %s233_s12, 32 }
  0x4f   : > { %p969_p4 = scmp.ne.s32.totalorder %s233_s12, %s968_s13  ;;  %p976_p5 = scmp.lt.s32.totalorder %s233_s12, %s233_s12 }
  0x50   : > { %p977_p10 = scmp.lt.s32.totalorder %s975_s10, %s968_s13 }
  0x51   : > { %p971_p7 = pnand %p969_p4, %p1278_p8 }
  0x52   : > { %p978_p3 = por %p977_p10, %p976_p5 }
  0x53   : > { %p972_p9 = pneg %p971_p7 }
  0x55   : > { %p979_p1 = pnand %p978_p3, %p972_p9 }
  0x57   : > { %982 = shalt.err (!%p979_p1)
}
  0x58   : > { %807 = dma.hbm_to_vmem [thread:$0]  (!%p1262_p6), %s1547_s2, 16, %s233_s12, [#allocation7]  }
  0x59   : > { %s1170_s15 = smov [#allocation11]   ;;  %s1171_s17 = smov [#allocation12]  }
  0x5a   : > { %s254_s16 = sshll.u32 %s1170_s15, 4  ;;  %s266_s19 = sshll.u32 %s1171_s17, 4  ;;  %s255_s16 = int_to_ptr.vmem [resolvable:$true] %s254_s16  ;;  %s267_s19 = int_to_ptr.vmem [resolvable:$true] %s266_s19 }
  0x5b   : > { %s983_s7 = scalar_lea.hbm %s1549_s4, 16 }
  0x5c   : > { %p984_p1 = scmp.ne.s32.totalorder %s1549_s4, %s983_s7  ;;  %p990_p12 = scmp.lt.u32.totalorder %s983_s7, %s1549_s4 }
  0x5e   : > { %p986_p3 = pnand %p984_p1, %p1278_p8 }
  0x60   : > { %p987_p11 = pneg %p986_p3 }
  0x62   : > { %p992_p13 = pnand %p990_p12, %p987_p11 }
  0x64   : > { %995 = shalt.err (!%p992_p13)
}
  0x65   : > { %s996_s12 = scalar_lea.vmem %s255_s16, 16  ;;  %s1003_s14 = scalar_lea.vmem %s255_s16, 32 }
  0x66   : > { %p997_p0 = scmp.ne.s32.totalorder %s255_s16, %s996_s12  ;;  %p1004_p7 = scmp.lt.s32.totalorder %s255_s16, %s255_s16 }
  0x67   : > { %p1005_p9 = scmp.lt.s32.totalorder %s1003_s14, %s996_s12 }
  0x68   : > { %p999_p2 = pnand %p997_p0, %p1278_p8 }
  0x69   : > { %p1006_p5 = por %p1005_p9, %p1004_p7 }
  0x6a   : > { %p1000_p4 = pneg %p999_p2 }
  0x6c   : > { %p1007_p10 = pnand %p1006_p5, %p1000_p4 }
  0x6e   : > { %1010 = shalt.err (!%p1007_p10)
}
  0x6f   : > { %813 = dma.hbm_to_vmem [thread:$0]  (!%p1262_p6), %s1549_s4, 16, %s255_s16, [#allocation10]  }
  0x70   : > { %s1011_s30 = scalar_lea.hbm %s1550_s5, 512 }
  0x71   : > { %p1012_p1 = scmp.ne.s32.totalorder %s1550_s5, %s1011_s30  ;;  %p1018_p12 = scmp.lt.u32.totalorder %s1011_s30, %s1550_s5 }
  0x73   : > { %p1014_p3 = pnand %p1012_p1, %p1278_p8 }
  0x75   : > { %p1015_p11 = pneg %p1014_p3 }
  0x77   : > { %p1020_p13 = pnand %p1018_p12, %p1015_p11 }
  0x79   : > { %1023 = shalt.err (!%p1020_p13)
}
  0x7a   : > { %s1024_s12 = scalar_lea.vmem %s267_s19, 512  ;;  %p1032_p7 = scmp.lt.s32.totalorder %s267_s19, %s267_s19 }
  0x7b   : > { %p1025_p0 = scmp.ne.s32.totalorder %s267_s19, %s1024_s12  ;;  %p1033_p9 = scmp.lt.s32.totalorder %s1024_s12, %s1024_s12 }
  0x7d   : > { %p1027_p2 = pnand %p1025_p0, %p1278_p8  ;;  %p1034_p5 = por %p1033_p9, %p1032_p7 }
  0x7f   : > { %p1028_p4 = pneg %p1027_p2 }
  0x81   : > { %p1035_p10 = pnand %p1034_p5, %p1028_p4 }
  0x83   : > { %1038 = shalt.err (!%p1035_p10)
}
  0x84   : > { %s1564_s16 = smov 128   ;;  %s706_s8 = sadd.s32 4294967294, %s1163_s26  }
  0x85   : > { %816 = dma.hbm_to_vmem [thread:$0]  (!%p1262_p6), %s1550_s5, 512, %s267_s19, [#allocation13], %s1564_s16, %s1564_s16, %s1169_s11  }
  0x86   : > { %s37_s18 = sadd.s32 1, %s1159_s25  ;;  %s44_s17 = sadd.s32 1, %s1151_s23 }
  0x87   : > { %p39_p8 = scmp.ge.s32.totalorder %s37_s18, 2  ;;  %p51_p1 = scmp.ne.s32.totalorder %s1151_s23, %s1147_s22 }
  0x88   : > { %p52_p3 = scmp.eq.s32.totalorder %s1163_s26, 0  ;;  %p57_p11 = scmp.ne.s32.totalorder %s1147_s22, %s1143_s21 }
  0x89   : > { %s1583_s18 = smov (%p39_p8, %s37_s18), 0  ;;  %p1566_p13 = scmp.ne.s32.totalorder %s1559_s28, 0 }
  0x8a   : > { %p1394_p12 = por %p52_p3, %p51_p1  ;;  %s41_s19 = ssub.s32 %s1159_s25, %s1583_s18 }
  0x8b   : > { %p1400_p6 = por %p1566_p13, %p57_p11  ;;  %s1568_s20 = sadd.s32 4294967295, %s1163_s26  }
  0x8c   : > { %p193_p0 = scmp.eq.s32.totalorder %s1568_s20, 1  ;;  %p42_p2 = scmp.eq.s32.totalorder %s41_s19, 0 }
  0x8d   : > { %p199_p4 = scmp.eq.s32.totalorder %s706_s8, 1  ;;  %p830_p9 = scmp.lt.s32.totalorder %s1163_s26, 2 }
  0x8e   : > { %p1408_p7 = por %p193_p0, %p51_p1  ;;  %s280_s10 = sand.u32 1, %s1151_s23  }
  0x8f   : > { %s1414_s7 = scalar_select %p42_p2, %s1151_s23, %s44_s17  }
  0x90   : > { %s1569_s30 = scalar_select %p1408_p7, 1, 0 }
  0x91   : > { %p1416_p5 = por %p199_p4, %p57_p11  ;;  %s714_s27 = sshll.u32 %s280_s10, 3 }
  0x92   : > { %s715_s12 = sshll.u32 %s1159_s25, 7  ;;  %s284_s8 = scalar_lea.vmem [#allocation3], %s714_s27 }
  0x93   : > { %s1570_s13 = scalar_select %p1416_p5, 1, 0 }
  0x94   : > { %s1425_s15 = scalar_lea.hbm %s1545_s0, %s715_s12  ;;  %s291_s19 = sshll.u32 %s284_s8, 4  ;;  %s1427_s19 = int_to_ptr.vmem [resolvable:$true] %s291_s19 }
  0x95   : > { %p1431_p10 = pnand %p830_p9, %p1394_p12  ;;  %s281_s20 = scalar_lea.sflag [#allocation4], %s280_s10 }
  0x96   : > { %s1039_s1 = scalar_lea.hbm %s1425_s15, 128  ;;  %s1044_s16 = scalar_lea.hbm %s1545_s0, 256 }
  0x97   : > { %p1040_p8 = scmp.ne.s32.totalorder %s1425_s15, %s1039_s1  ;;  %p1041_p1 = pneg %p1431_p10 }
  0x98   : > { %p1045_p12 = scmp.lt.u32.totalorder %s1425_s15, %s1545_s0  ;;  %p1046_p13 = scmp.lt.u32.totalorder %s1044_s16, %s1039_s1 }
  0x99   : > { %p1042_p3 = pnand %p1041_p1, %p1040_p8  ;;  %p1048_p2 = scmp.lt.u32.totalorder %s1039_s1, %s1425_s15 }
  0x9a   : > { %p1047_p0 = por %p1046_p13, %p1045_p12 }
  0x9b   : > { %p1043_p11 = pneg %p1042_p3 }
  0x9c   : > { %p1049_p4 = por %p1048_p2, %p1047_p0 }
  0x9e   : > { %p1050_p9 = pnand %p1049_p4, %p1043_p11 }
  0xa0   : > { %1053 = shalt.err (!%p1050_p9)
}
  0xa1   : > { %s1054_s10 = scalar_lea.vmem %s1427_s19, 128  ;;  %s1172_s8 = smov [#allocation3]  }
  0xa2   : > { %p1055_p8 = scmp.ne.s32.totalorder %s1427_s19, %s1054_s10  ;;  %s1059_s27 = sshll.u32 %s1172_s8, 4  ;;  %s1060_s27 = int_to_ptr.vmem [resolvable:$false] %s1059_s27 }
  0xa3   : > { %s1061_s12 = scalar_lea.vmem %s1060_s27, 256  ;;  %p1062_p7 = scmp.lt.s32.totalorder %s1427_s19, %s1060_s27 }
  0xa4   : > { %p1057_p3 = pnand %p1055_p8, %p1041_p1  ;;  %p1063_p12 = scmp.lt.s32.totalorder %s1061_s12, %s1054_s10 }
  0xa6   : > { %p1058_p5 = pneg %p1057_p3  ;;  %p1064_p13 = por %p1063_p12, %p1062_p7 }
  0xa8   : > { %p1065_p0 = pnand %p1064_p13, %p1058_p5 }
  0xaa   : > { %1068 = shalt.err (!%p1065_p0)
}
  0xab   : > { %820 = dma.hbm_to_vmem [thread:$0]  (!%p1431_p10), %s1425_s15, 128, %s1427_s19, %s281_s20  }
  0xac   : > { %p1572_p11 = scmp.ne.s32.totalorder %s1560_s29, 0 }
  0xad   : > { %s1463_s1 = sand.u32 (!%p1572_p11), 1, %s1147_s22  }
  0xae   : > { %300 = sbr.rel (%p1572_p11) target bundleno = 978 (0x3d2), region = 44  ;;  %s717_s16 = sshll.u32 (!%p1572_p11), %s1463_s1, 3 }
  0xaf   : > { %s303_s9 = scalar_lea.sflag (!%p1572_p11), [#allocation4], %s1463_s1  ;;  %s306_s14 = scalar_lea.vmem (!%p1572_p11), [#allocation3], %s717_s16 }
  0xb5   : > { %1122 = dma.done.wait (%p1400_p6), %s303_s9, 128  }
  0xb6   : > { %1124 = vsyncadd (%p1400_p6), %s303_s9, 4294967168  ;;  %p1573_p7 = scmp.ne.s32.totalorder %s1559_s28, 0 }
  0xb8   : > { %1126 = dma.done.wait (%p1573_p7), [#allocation7], 528  }
  0xb9   : > { %1128 = vsyncadd (%p1573_p7), [#allocation7], 4294966768 }
  0xba   : > { %1130 = dma.done.wait (%p1573_p7), [#allocation10], 32  }
  0xbb   : > { %1132 = vsyncadd (%p1573_p7), [#allocation10], 4294967264 }
  0xbc   : > { %1134 = dma.done.wait (%p1573_p7), [#allocation13], 512  }
  0xbd   : > { %1136 = vsyncadd (%p1573_p7), [#allocation13], 4294966784  ;;  %v1173_v0 = vmov 0.0|0.0   ;;  %vm1174_vm0 = vmmov 0   ;;  %v1175_v1 = vmov 0.0   ;;  %v360_v2 = vld [vmem:[#allocation6] sm:$0xff] }
  0xbe   : > { %765 = vmatprep.subr.bf16.mxu0 %v1173_v0  ;;  %751 = vmatprep.mubr.msk.f32.mxu0 %vm1174_vm0, %v1175_v1  ;;  %v361_v3 = vld [vmem:[#allocation6 + $0x8] sm:$0xff]  ;;  %v362_v4 = vld [vmem:[#allocation6 + $0x10] sm:$0xff]  ;;  %v363_v6 = vld [vmem:[#allocation6 + $0x18] sm:$0xff]  ;;  %vm371_vm1 = vcmask 261120   ;;  %s354_s28 = scalar_lea.vmem [#allocation14], %s717_s16  ;;  %s730_s11 = sshll.u32 %s1155_s24, 7 }
  0xbf   : > { %771 = vmatprep.subr.bf16.mxu1 %v1173_v0  ;;  %762 = vmatprep.mubr.msk.f32.mxu1 %vm1174_vm0, %v1175_v1  ;;  %v766_v5 = vpack.c.bf16 %v361_v3, %v360_v2  ;;  %v769_v7 = vpack.c.bf16 %v363_v6, %v362_v4  ;;  %v359_v8 = vld [vmem:[%s306_s14] sm:$0xff]  ;;  %v724_v9 = vld [vmem:[#allocation8] ss:$0 sm:$0xff]  ;;  %v482_v24 = vld [vmem:[#allocation12] sm:$0xff]  ;;  %s576_s29 = sshll.u32 %s354_s28, 4  ;;  %s1498_s17 = scalar_lea.hbm %s1551_s6, %s730_s11  ;;  %s1493_s29 = int_to_ptr.vmem [resolvable:$true] %s576_s29 }
  0xc0   : > { %v483_v25 = vld [vmem:[#allocation12 + $0x8] sm:$0xff]  ;;  %v484_v27 = vld [vmem:[#allocation12 + $0x10] sm:$0xff]  ;;  %v485_v28 = vld [vmem:[#allocation12 + $0x18] sm:$0xff]  ;;  %s562_s20 = scalar_lea.sflag [#allocation5], %s1463_s1  ;;  %s1069_s10 = scalar_lea.vmem %s1493_s29, 128 }
  0xc1   : > { %767 = vmatpush3.bf16.msra.mxu0 %v766_v5  ;;  %v772_v26 = vpack.c.bf16 %v483_v25, %v482_v24  ;;  %v775_v29 = vpack.c.bf16 %v485_v28, %v484_v27  ;;  %v726_v34 = vld [vmem:[#allocation9] ss:$0 sm:$0xff]  ;;  %v727_v36 = vld [vmem:[#allocation11] ss:$0 sm:$0xff]  ;;  %p1070_p6 = scmp.ne.s32.totalorder %s1493_s29, %s1069_s10  ;;  %p1574_p5 = scmp.ne.s32.totalorder %s1569_s30, 0 }
  0xc2   : > { %768 = vmatprep.subr.bf16.mxu0 %v1173_v0  ;;  %s1176_s24 = smov [#allocation14]  }
  0xc3   : > { %773 = vmatpush3.bf16.msra.mxu1 %v772_v26  ;;  %p1071_p10 = pnand %p1070_p6, %p1574_p5  ;;  %s1073_s8 = sshll.u32 %s1176_s24, 4  ;;  %s1074_s8 = int_to_ptr.vmem [resolvable:$false] %s1073_s8 }
  0xc4   : > { %774 = vmatprep.subr.bf16.mxu1 %v1173_v0  ;;  %s1075_s27 = scalar_lea.vmem %s1074_s8, 256  ;;  %p1076_p2 = scmp.lt.s32.totalorder %s1493_s29, %s1074_s8 }
  0xc5   : > { %770 = vmatpush3.bf16.msra.mxu0 %v769_v7  ;;  %p1072_p1 = pneg %p1071_p10  ;;  %p1077_p4 = scmp.lt.s32.totalorder %s1075_s27, %s1069_s10 }
  0xc7   : > { %776 = vmatpush3.bf16.msra.mxu1 %v775_v29  ;;  %p1078_p9 = por %p1077_p4, %p1076_p2 }
  0xc8   : > { %752 = vmatmul.mubr.msk.f32.vlgmr.msra.gmra.mrb[0].mxu0 %vm371_vm1, %v359_v8 }
  0xc9   : > { %p1079_p8 = pnand %p1078_p9, %p1072_p1 }
 0x19b   : > { %v441_v10 = vpop.f32.mrb[0].mxu0 }
 0x19c   : > { %v442_v11 = vadd.f32 %v724_v9, %v441_v10  ;;  %v753_v12 = vpop.f32.mrb[1].mxu0 }
 0x19e   : > { %v446_v13 = vmul.f32 0.70710677, %v442_v11  ;;  %v445_v15 = vmul.f32 0.5, %v442_v11 }
 0x1a0   : > { %895 = verf.f32 %v446_v13 }
 0x1aa   : > { %v896_v14 = vpop.eup %895 }
 0x1ab   : > { %v448_v16 = vadd.f32 1.0, %v896_v14 }
 0x1ad   : > { %v449_v17 = vmul.f32 %v448_v16, %v445_v15 }
 0x1af   : > { %v450_v18 = vsel %vm371_vm1, %v449_v17, 0.0 }
 0x1b0   : > { %451 = vadd.xlane.f32.xlu0 %v450_v18 }
 0x23d   : > { %v452_v19 = vpop.xlane.xlu0 %451 }
 0x23e   : > { %v454_v20 = vmul.f32 0.03125, %v452_v19 }
 0x240   : > { %v455_v21 = vsub.f32 %v449_v17, %v454_v20 }
 0x242   : > { %v456_v22 = vmul.f32 %v455_v21, %v455_v21 }
 0x244   : > { %v457_v23 = vsel %vm371_vm1, %v456_v22, 0.0 }
 0x245   : > { %458 = vadd.xlane.f32.xlu0 %v457_v23 }
 0x2d2   : > { %v459_v30 = vpop.xlane.xlu0 %458 }
 0x2d3   : > { %v460_v31 = vmul.f32 0.03125, %v459_v30 }
 0x2d5   : > { %v461_v32 = vadd.f32 1e-12, %v460_v31 }
 0x2d7   : > { %897 = vrsqrt.f32 %v461_v32 }
 0x2e1   : > { %v898_v33 = vpop.eup %897 }
 0x2e2   : > { %v463_v35 = vmul.f32 %v898_v33, %v455_v21 }
 0x2e4   : > { %v471_v37 = vmul.f32 %v726_v34, %v463_v35 }
 0x2e6   : > { %v479_v38 = vadd.f32 %v727_v36, %v471_v37 }
 0x2e8   : > { %480 = vst.msk [vmem:[#allocation2] sm:$0xff] %vm371_vm1, %v479_v38 }
 0x2ef   : > { %v481_v39 = vld [vmem:[#allocation2] sm:$0xff] }
 0x2f0   : > { %763 = vmatmul.mubr.msk.f32.vlgmr.msra.gmra.mrb[0].mxu1 %vm371_vm1, %v481_v39 }
 0x3c3   : > { %v556_v40 = vpop.f32.mrb[0].mxu1 }
 0x3c4   : > { %560 = vst [vmem:[%s354_s28] sm:$0xff] %v556_v40  ;;  %v764_v41 = vpop.f32.mrb[1].mxu1 }
 0x3c5   : > { %1082 = shalt.err (!%p1079_p8)
}
 0x3c6   : > { %s1083_s12 = scalar_lea.hbm %s1498_s17, 128  ;;  %s1087_s9 = scalar_lea.hbm %s1551_s6, 256 }
 0x3c7   : > { %p1084_p3 = scmp.ne.s32.totalorder %s1498_s17, %s1083_s12  ;;  %p1088_p0 = scmp.lt.u32.totalorder %s1498_s17, %s1551_s6 }
 0x3c8   : > { %p1089_p11 = scmp.lt.u32.totalorder %s1087_s9, %s1083_s12  ;;  %p1091_p6 = scmp.lt.u32.totalorder %s1083_s12, %s1498_s17 }
 0x3c9   : > { %p1085_p12 = pnand %p1084_p3, %p1574_p5 }
 0x3ca   : > { %p1090_p7 = por %p1089_p11, %p1088_p0 }
 0x3cb   : > { %p1086_p13 = pneg %p1085_p12 }
 0x3cc   : > { %p1092_p10 = por %p1091_p6, %p1090_p7 }
 0x3ce   : > { %p1093_p1 = pnand %p1092_p10, %p1086_p13 }
 0x3d0   : > { %1096 = shalt.err (!%p1093_p1)
}
 0x3d1   : > { %799 = dma.vmem_to_hbm [thread:$0]  (%p1574_p5), %s1493_s29, 128, %s1498_s17, %s562_s20  }
 0x3d2 PF: > { %s588_s11 = sand.u32 1, %s1143_s21   ;;  %p1575_p2 = scmp.ne.s32.totalorder %s1570_s13, 0 }
 0x3d3   : > { %p1576_p4 = scmp.ge.s32.totalorder %s1163_s26, 2  ;;  %s589_s15 = scalar_lea.sflag [#allocation5], %s588_s11 }
 0x3d5   : > { %p822_p9 = pnand %p1576_p4, %p1575_p2 }
 0x3d7   : > { %1138 = dma.done.wait (!%p822_p9), %s589_s15, 128  }
 0x3d8   : > { %1140 = vsyncadd (!%p822_p9), %s589_s15, 4294967168  ;;  %s25_s26 = sadd.s32 1, %s1163_s26   ;;  %s1577_s21 = smov %s1147_s22 }
 0x3d9   : > { %p22_p8 = scmp.ge.s32.totalorder %s25_s26, 4   ;;  %s1578_s22 = smov %s1151_s23 }
 0x3da   : > { %s1579_s23 = smov %s1414_s7  ;;  %s1580_s24 = smov %s1159_s25 }
 0x3db   : > { %s1581_s25 = smov %s1583_s18  ;;  %24 = sbr.rel (!%p22_p8) target bundleno = 11 (0xb), region = 114 }
 0x3e2   :  { %594 = vsyncpa [#allocation4], 1 }
 0x3e3   :  { %596 = vsyncpa [#allocation4 + $0x1], 1 }
 0x3e4   :  { %597 = vsyncpa [#allocation7], 1 }
 0x3e5   :  { %598 = vsyncpa [#allocation10], 1 }
 0x3e6   :  { %599 = vsyncpa [#allocation13], 1 }
 0x3e7   :  { %600 = vsyncpa [#allocation5], 1 }
 0x3e8   :  { %602 = vsyncpa [#allocation5 + $0x1], 1 }

// kernel: tpu_custom_call.1
= control target key start
LH: loop header
LB: loop body
LE: loop exit
PB: predicated region body
PF: predicated region fallthrough
CT: control target
= control target key end

     0   :  { %s1545_s0 = inlined_call_operand.hbm [shape: f32[16,32], index: 0, kind: input, shape index: {}]   ;;  %s1546_s1 = inlined_call_operand.hbm [shape: f32[32,32], index: 1, kind: input, shape index: {}]   ;;  %s1547_s2 = inlined_call_operand.hbm [shape: f32[1,32], index: 2, kind: input, shape index: {}]   ;;  %s1548_s3 = inlined_call_operand.hbm [shape: f32[1,32], index: 3, kind: input, shape index: {}]   ;;  %s1549_s4 = inlined_call_operand.hbm [shape: f32[1,32], index: 4, kind: input, shape index: {}]   ;;  %s1550_s5 = inlined_call_operand.hbm [shape: f32[32,128], index: 5, kind: input, shape index: {}]   ;;  %s1551_s6 = inlined_call_operand.hbm [shape: f32[16,128], index: 6, kind: output, shape index: {}]  }
   0x1   :  { %1558 = sst [smem:[#allocation20_spill]] %s1546_s1 }
   0x2   :  { %11 = vsyncpa [#allocation4], 0 }
   0x3   :  { %13 = vsyncpa [#allocation4 + $0x1], 0 }
   0x4   :  { %14 = vsyncpa [#allocation7], 0 }
   0x5   :  { %15 = vsyncpa [#allocation10], 0 }
   0x6   :  { %16 = vsyncpa [#allocation13], 0 }
   0x7   :  { %17 = vsyncpa [#allocation5], 0 }
   0x8   :  { %19 = vsyncpa [#allocation5 + $0x1], 0  ;;  %s1212_s21 = smov 0   ;;  %s1214_s22 = smov 0  }
   0x9   :  { %s1216_s23 = smov 0   ;;  %s1218_s24 = smov 0  }
   0xa   :  { %s1220_s25 = smov 0   ;;  %s1222_s26 = smov 0  }
   0xb LB: > { %s1552_s27 = sadd.s32 4294967295, %s1163_s26   ;;  %p707_p0 = scmp.ge.s32.totalorder %s1163_s26, 1  ;;  %s1163_s26 = sphi %s1222_s26, %s25_s26   ;;  %s1159_s25 = sphi %s1220_s25, %s1581_s25   ;;  %s1155_s24 = sphi %s1218_s24, %s1580_s24   ;;  %s1151_s23 = sphi %s1216_s23, %s1579_s23   ;;  %s1147_s22 = sphi %s1214_s22, %s1578_s22   ;;  %s1143_s21 = sphi %s1212_s21, %s1577_s21  }
   0xc   : > { %p1246_p1 = scmp.eq.s32.totalorder %s1552_s27, 0  ;;  %p206_p2 = scmp.lt.s32.totalorder %s1163_s26, 3 }
   0xd   : > { %s1165_s30 = smov [#allocation6]   ;;  %s1166_s9 = smov [#allocation9]  }
   0xe   : > { %s1559_s28 = scalar_select %p1246_p1, 1, 0 }
   0xf   : > { %p1251_p3 = pnand %p707_p0, %p206_p2  ;;  %s218_s7 = sshll.u32 %s1165_s30, 4  ;;  %s1255_s7 = int_to_ptr.vmem [resolvable:$true] %s218_s7 }
  0x10   : > { %s243_s10 = sshll.u32 %s1166_s9, 4  ;;  %s1167_s11 = smov [#allocation8]   ;;  %s1266_s10 = int_to_ptr.vmem [resolvable:$true] %s243_s10 }
  0x11   : > { %s1560_s29 = scalar_select %p1251_p3, 1, 0 }
  0x12   : > { %p801_p4 = pneg %p1251_p3  ;;  %s1268_s12 = sshll.u32 %s1167_s11, 4  ;;  %s233_s12 = int_to_ptr.vmem [resolvable:$true] %s1268_s12 }
  0x13   : > { %s1562_s1 = sld [smem:[#allocation20_spill]] }
  0x14   : > { %p1262_p6 = pnand %p801_p4, %p1246_p1 }
  0x16   : > { %p1278_p8 = pneg %p1262_p6 }
  0x19   : > { %s899_s15 = scalar_lea.hbm %s1562_s1, 512 }
  0x1a   : > { %p900_p7 = scmp.ne.s32.totalorder %s1562_s1, %s899_s15  ;;  %p906_p11 = scmp.lt.u32.totalorder %s899_s15, %s1562_s1 }
  0x1c   : > { %p902_p9 = pnand %p1278_p8, %p900_p7 }
  0x1e   : > { %p903_p10 = pneg %p902_p9 }
  0x20   : > { %p908_p12 = pnand %p906_p11, %p903_p10 }
  0x22   : > { %911 = shalt.err (!%p908_p12)
}
  0x23   : > { %s912_s30 = scalar_lea.vmem %s1255_s7, 512  ;;  %p920_p4 = scmp.lt.s32.totalorder %s1255_s7, %s1255_s7 }
  0x24   : > { %p913_p13 = scmp.ne.s32.totalorder %s1255_s7, %s912_s30  ;;  %p921_p5 = scmp.lt.s32.totalorder %s912_s30, %s912_s30 }
  0x26   : > { %p915_p0 = pnand %p913_p13, %p1278_p8  ;;  %p922_p7 = por %p921_p5, %p920_p4 }
  0x28   : > { %p916_p2 = pneg %p915_p0 }
  0x2a   : > { %p923_p9 = pnand %p922_p7, %p916_p2 }
  0x2c   : > { %926 = shalt.err (!%p923_p9)
}
  0x2d   : > { %s1556_s9 = smov 128   ;;  %s1169_s11 = smov 8  }
  0x2e   : > { %804 = dma.hbm_to_vmem [thread:$0]  (!%p1262_p6), %s1562_s1, 512, %s1255_s7, [#allocation7], %s1556_s9, %s1556_s9, %s1169_s11  }
  0x2f   : > { %s927_s17 = scalar_lea.hbm %s1548_s3, 16 }
  0x30   : > { %p928_p5 = scmp.ne.s32.totalorder %s1548_s3, %s927_s17  ;;  %p934_p12 = scmp.lt.u32.totalorder %s927_s17, %s1548_s3 }
  0x32   : > { %p930_p10 = pnand %p928_p5, %p1278_p8 }
  0x34   : > { %p931_p11 = pneg %p930_p10 }
  0x36   : > { %p936_p13 = pnand %p934_p12, %p931_p11 }
  0x38   : > { %939 = shalt.err (!%p936_p13)
}
  0x39   : > { %s940_s7 = scalar_lea.vmem %s1266_s10, 16  ;;  %s947_s13 = scalar_lea.vmem %s1266_s10, 32 }
  0x3a   : > { %p941_p0 = scmp.ne.s32.totalorder %s1266_s10, %s940_s7  ;;  %p948_p7 = scmp.lt.s32.totalorder %s1266_s10, %s1266_s10 }
  0x3b   : > { %p949_p9 = scmp.lt.s32.totalorder %s947_s13, %s940_s7 }
  0x3c   : > { %p943_p2 = pnand %p941_p0, %p1278_p8 }
  0x3d   : > { %p950_p5 = por %p949_p9, %p948_p7 }
  0x3e   : > { %p944_p4 = pneg %p943_p2 }
  0x40   : > { %p951_p10 = pnand %p950_p5, %p944_p4 }
  0x42   : > { %954 = shalt.err (!%p951_p10)
}
  0x43   : > { %810 = dma.hbm_to_vmem [thread:$0]  (!%p1262_p6), %s1548_s3, 16, %s1266_s10, [#allocation10]  }
  0x44   : > { %s955_s17 = scalar_lea.hbm %s1547_s2, 16 }
  0x45   : > { %p956_p11 = scmp.ne.s32.totalorder %s1547_s2, %s955_s17  ;;  %p962_p0 = scmp.lt.u32.totalorder %s955_s17, %s1547_s2 }
  0x47   : > { %p958_p12 = pnand %p956_p11, %p1278_p8 }
  0x49   : > { %p959_p13 = pneg %p958_p12 }
  0x4b   : > { %p964_p2 = pnand %p962_p0, %p959_p13 }
  0x4d   : > { %967 = shalt.err (!%p964_p2)
}
  0x4e   : > { %s968_s13 = scalar_lea.vmem %s233_s12, 16  ;;  %s975_s10 = scalar_lea.vmem %s233_s12, 32 }
  0x4f   : > { %p969_p4 = scmp.ne.s32.totalorder %s233_s12, %s968_s13  ;;  %p976_p5 = scmp.lt.s32.totalorder %s233_s12, %s233_s12 }
  0x50   : > { %p977_p10 = scmp.lt.s32.totalorder %s975_s10, %s968_s13 }
  0x51   : > { %p971_p7 = pnand %p969_p4, %p1278_p8 }
  0x52   : > { %p978_p3 = por %p977_p10, %p976_p5 }
  0x53   : > { %p972_p9 = pneg %p971_p7 }
  0x55   : > { %p979_p1 = pnand %p978_p3, %p972_p9 }
  0x57   : > { %982 = shalt.err (!%p979_p1)
}
  0x58   : > { %807 = dma.hbm_to_vmem [thread:$0]  (!%p1262_p6), %s1547_s2, 16, %s233_s12, [#allocation7]  }
  0x59   : > { %s1170_s15 = smov [#allocation11]   ;;  %s1171_s17 = smov [#allocation12]  }
  0x5a   : > { %s254_s16 = sshll.u32 %s1170_s15, 4  ;;  %s266_s19 = sshll.u32 %s1171_s17, 4  ;;  %s255_s16 = int_to_ptr.vmem [resolvable:$true] %s254_s16  ;;  %s267_s19 = int_to_ptr.vmem [resolvable:$true] %s266_s19 }
  0x5b   : > { %s983_s7 = scalar_lea.hbm %s1549_s4, 16 }
  0x5c   : > { %p984_p1 = scmp.ne.s32.totalorder %s1549_s4, %s983_s7  ;;  %p990_p12 = scmp.lt.u32.totalorder %s983_s7, %s1549_s4 }
  0x5e   : > { %p986_p3 = pnand %p984_p1, %p1278_p8 }
  0x60   : > { %p987_p11 = pneg %p986_p3 }
  0x62   : > { %p992_p13 = pnand %p990_p12, %p987_p11 }
  0x64   : > { %995 = shalt.err (!%p992_p13)
}
  0x65   : > { %s996_s12 = scalar_lea.vmem %s255_s16, 16  ;;  %s1003_s14 = scalar_lea.vmem %s255_s16, 32 }
  0x66   : > { %p997_p0 = scmp.ne.s32.totalorder %s255_s16, %s996_s12  ;;  %p1004_p7 = scmp.lt.s32.totalorder %s255_s16, %s255_s16 }
  0x67   : > { %p1005_p9 = scmp.lt.s32.totalorder %s1003_s14, %s996_s12 }
  0x68   : > { %p999_p2 = pnand %p997_p0, %p1278_p8 }
  0x69   : > { %p1006_p5 = por %p1005_p9, %p1004_p7 }
  0x6a   : > { %p1000_p4 = pneg %p999_p2 }
  0x6c   : > { %p1007_p10 = pnand %p1006_p5, %p1000_p4 }
  0x6e   : > { %1010 = shalt.err (!%p1007_p10)
}
  0x6f   : > { %813 = dma.hbm_to_vmem [thread:$0]  (!%p1262_p6), %s1549_s4, 16, %s255_s16, [#allocation10]  }
  0x70   : > { %s1011_s30 = scalar_lea.hbm %s1550_s5, 512 }
  0x71   : > { %p1012_p1 = scmp.ne.s32.totalorder %s1550_s5, %s1011_s30  ;;  %p1018_p12 = scmp.lt.u32.totalorder %s1011_s30, %s1550_s5 }
  0x73   : > { %p1014_p3 = pnand %p1012_p1, %p1278_p8 }
  0x75   : > { %p1015_p11 = pneg %p1014_p3 }
  0x77   : > { %p1020_p13 = pnand %p1018_p12, %p1015_p11 }
  0x79   : > { %1023 = shalt.err (!%p1020_p13)
}
  0x7a   : > { %s1024_s12 = scalar_lea.vmem %s267_s19, 512  ;;  %p1032_p7 = scmp.lt.s32.totalorder %s267_s19, %s267_s19 }
  0x7b   : > { %p1025_p0 = scmp.ne.s32.totalorder %s267_s19, %s1024_s12  ;;  %p1033_p9 = scmp.lt.s32.totalorder %s1024_s12, %s1024_s12 }
  0x7d   : > { %p1027_p2 = pnand %p1025_p0, %p1278_p8  ;;  %p1034_p5 = por %p1033_p9, %p1032_p7 }
  0x7f   : > { %p1028_p4 = pneg %p1027_p2 }
  0x81   : > { %p1035_p10 = pnand %p1034_p5, %p1028_p4 }
  0x83   : > { %1038 = shalt.err (!%p1035_p10)
}
  0x84   : > { %s1564_s16 = smov 128   ;;  %s706_s8 = sadd.s32 4294967294, %s1163_s26  }
  0x85   : > { %816 = dma.hbm_to_vmem [thread:$0]  (!%p1262_p6), %s1550_s5, 512, %s267_s19, [#allocation13], %s1564_s16, %s1564_s16, %s1169_s11  }
  0x86   : > { %s37_s18 = sadd.s32 1, %s1159_s25  ;;  %s44_s17 = sadd.s32 1, %s1151_s23 }
  0x87   : > { %p39_p8 = scmp.ge.s32.totalorder %s37_s18, 2  ;;  %p51_p1 = scmp.ne.s32.totalorder %s1151_s23, %s1147_s22 }
  0x88   : > { %p52_p3 = scmp.eq.s32.totalorder %s1163_s26, 0  ;;  %p57_p11 = scmp.ne.s32.totalorder %s1147_s22, %s1143_s21 }
  0x89   : > { %s1583_s18 = smov (%p39_p8, %s37_s18), 0  ;;  %p1566_p13 = scmp.ne.s32.totalorder %s1559_s28, 0 }
  0x8a   : > { %p1394_p12 = por %p52_p3, %p51_p1  ;;  %s41_s19 = ssub.s32 %s1159_s25, %s1583_s18 }
  0x8b   : > { %p1400_p6 = por %p1566_p13, %p57_p11  ;;  %s1568_s20 = sadd.s32 4294967295, %s1163_s26  }
  0x8c   : > { %p193_p0 = scmp.eq.s32.totalorder %s1568_s20, 1  ;;  %p42_p2 = scmp.eq.s32.totalorder %s41_s19, 0 }
  0x8d   : > { %p199_p4 = scmp.eq.s32.totalorder %s706_s8, 1  ;;  %p830_p9 = scmp.lt.s32.totalorder %s1163_s26, 2 }
  0x8e   : > { %p1408_p7 = por %p193_p0, %p51_p1  ;;  %s280_s10 = sand.u32 1, %s1151_s23  }
  0x8f   : > { %s1414_s7 = scalar_select %p42_p2, %s1151_s23, %s44_s17  }
  0x90   : > { %s1569_s30 = scalar_select %p1408_p7, 1, 0 }
  0x91   : > { %p1416_p5 = por %p199_p4, %p57_p11  ;;  %s714_s27 = sshll.u32 %s280_s10, 3 }
  0x92   : > { %s715_s12 = sshll.u32 %s1159_s25, 7  ;;  %s284_s8 = scalar_lea.vmem [#allocation3], %s714_s27 }
  0x93   : > { %s1570_s13 = scalar_select %p1416_p5, 1, 0 }
  0x94   : > { %s1425_s15 = scalar_lea.hbm %s1545_s0, %s715_s12  ;;  %s291_s19 = sshll.u32 %s284_s8, 4  ;;  %s1427_s19 = int_to_ptr.vmem [resolvable:$true] %s291_s19 }
  0x95   : > { %p1431_p10 = pnand %p830_p9, %p1394_p12  ;;  %s281_s20 = scalar_lea.sflag [#allocation4], %s280_s10 }
  0x96   : > { %s1039_s1 = scalar_lea.hbm %s1425_s15, 128  ;;  %s1044_s16 = scalar_lea.hbm %s1545_s0, 256 }
  0x97   : > { %p1040_p8 = scmp.ne.s32.totalorder %s1425_s15, %s1039_s1  ;;  %p1041_p1 = pneg %p1431_p10 }
  0x98   : > { %p1045_p12 = scmp.lt.u32.totalorder %s1425_s15, %s1545_s0  ;;  %p1046_p13 = scmp.lt.u32.totalorder %s1044_s16, %s1039_s1 }
  0x99   : > { %p1042_p3 = pnand %p1041_p1, %p1040_p8  ;;  %p1048_p2 = scmp.lt.u32.totalorder %s1039_s1, %s1425_s15 }
  0x9a   : > { %p1047_p0 = por %p1046_p13, %p1045_p12 }
  0x9b   : > { %p1043_p11 = pneg %p1042_p3 }
  0x9c   : > { %p1049_p4 = por %p1048_p2, %p1047_p0 }
  0x9e   : > { %p1050_p9 = pnand %p1049_p4, %p1043_p11 }
  0xa0   : > { %1053 = shalt.err (!%p1050_p9)
}
  0xa1   : > { %s1054_s10 = scalar_lea.vmem %s1427_s19, 128  ;;  %s1172_s8 = smov [#allocation3]  }
  0xa2   : > { %p1055_p8 = scmp.ne.s32.totalorder %s1427_s19, %s1054_s10  ;;  %s1059_s27 = sshll.u32 %s1172_s8, 4  ;;  %s1060_s27 = int_to_ptr.vmem [resolvable:$false] %s1059_s27 }
  0xa3   : > { %s1061_s12 = scalar_lea.vmem %s1060_s27, 256  ;;  %p1062_p7 = scmp.lt.s32.totalorder %s1427_s19, %s1060_s27 }
  0xa4   : > { %p1057_p3 = pnand %p1055_p8, %p1041_p1  ;;  %p1063_p12 = scmp.lt.s32.totalorder %s1061_s12, %s1054_s10 }
  0xa6   : > { %p1058_p5 = pneg %p1057_p3  ;;  %p1064_p13 = por %p1063_p12, %p1062_p7 }
  0xa8   : > { %p1065_p0 = pnand %p1064_p13, %p1058_p5 }
  0xaa   : > { %1068 = shalt.err (!%p1065_p0)
}
  0xab   : > { %820 = dma.hbm_to_vmem [thread:$0]  (!%p1431_p10), %s1425_s15, 128, %s1427_s19, %s281_s20  }
  0xac   : > { %p1572_p11 = scmp.ne.s32.totalorder %s1560_s29, 0 }
  0xad   : > { %s1463_s1 = sand.u32 (!%p1572_p11), 1, %s1147_s22  }
  0xae   : > { %300 = sbr.rel (%p1572_p11) target bundleno = 978 (0x3d2), region = 44  ;;  %s717_s16 = sshll.u32 (!%p1572_p11), %s1463_s1, 3 }
  0xaf   : > { %s303_s9 = scalar_lea.sflag (!%p1572_p11), [#allocation4], %s1463_s1  ;;  %s306_s14 = scalar_lea.vmem (!%p1572_p11), [#allocation3], %s717_s16 }
  0xb5   : > { %1122 = dma.done.wait (%p1400_p6), %s303_s9, 128  }
  0xb6   : > { %1124 = vsyncadd (%p1400_p6), %s303_s9, 4294967168  ;;  %p1573_p7 = scmp.ne.s32.totalorder %s1559_s28, 0 }
  0xb8   : > { %1126 = dma.done.wait (%p1573_p7), [#allocation7], 528  }
  0xb9   : > { %1128 = vsyncadd (%p1573_p7), [#allocation7], 4294966768 }
  0xba   : > { %1130 = dma.done.wait (%p1573_p7), [#allocation10], 32  }
  0xbb   : > { %1132 = vsyncadd (%p1573_p7), [#allocation10], 4294967264 }
  0xbc   : > { %1134 = dma.done.wait (%p1573_p7), [#allocation13], 512  }
  0xbd   : > { %1136 = vsyncadd (%p1573_p7), [#allocation13], 4294966784  ;;  %v1173_v0 = vmov 0.0|0.0   ;;  %vm1174_vm0 = vmmov 0   ;;  %v1175_v1 = vmov 0.0   ;;  %v360_v2 = vld [vmem:[#allocation6] sm:$0xff] }
  0xbe   : > { %765 = vmatprep.subr.bf16.mxu0 %v1173_v0  ;;  %751 = vmatprep.mubr.msk.f32.mxu0 %vm1174_vm0, %v1175_v1  ;;  %v361_v3 = vld [vmem:[#allocation6 + $0x8] sm:$0xff]  ;;  %v362_v4 = vld [vmem:[#allocation6 + $0x10] sm:$0xff]  ;;  %v363_v6 = vld [vmem:[#allocation6 + $0x18] sm:$0xff]  ;;  %vm371_vm1 = vcmask 261120   ;;  %s354_s28 = scalar_lea.vmem [#allocation14], %s717_s16  ;;  %s730_s11 = sshll.u32 %s1155_s24, 7 }
  0xbf   : > { %771 = vmatprep.subr.bf16.mxu1 %v1173_v0  ;;  %762 = vmatprep.mubr.msk.f32.mxu1 %vm1174_vm0, %v1175_v1  ;;  %v766_v5 = vpack.c.bf16 %v361_v3, %v360_v2  ;;  %v769_v7 = vpack.c.bf16 %v363_v6, %v362_v4  ;;  %v359_v8 = vld [vmem:[%s306_s14] sm:$0xff]  ;;  %v724_v9 = vld [vmem:[#allocation8] ss:$0 sm:$0xff]  ;;  %v482_v24 = vld [vmem:[#allocation12] sm:$0xff]  ;;  %s576_s29 = sshll.u32 %s354_s28, 4  ;;  %s1498_s17 = scalar_lea.hbm %s1551_s6, %s730_s11  ;;  %s1493_s29 = int_to_ptr.vmem [resolvable:$true] %s576_s29 }
  0xc0   : > { %v483_v25 = vld [vmem:[#allocation12 + $0x8] sm:$0xff]  ;;  %v484_v27 = vld [vmem:[#allocation12 + $0x10] sm:$0xff]  ;;  %v485_v28 = vld [vmem:[#allocation12 + $0x18] sm:$0xff]  ;;  %s562_s20 = scalar_lea.sflag [#allocation5], %s1463_s1  ;;  %s1069_s10 = scalar_lea.vmem %s1493_s29, 128 }
  0xc1   : > { %767 = vmatpush3.bf16.msra.mxu0 %v766_v5  ;;  %v772_v26 = vpack.c.bf16 %v483_v25, %v482_v24  ;;  %v775_v29 = vpack.c.bf16 %v485_v28, %v484_v27  ;;  %v726_v34 = vld [vmem:[#allocation9] ss:$0 sm:$0xff]  ;;  %v727_v36 = vld [vmem:[#allocation11] ss:$0 sm:$0xff]  ;;  %p1070_p6 = scmp.ne.s32.totalorder %s1493_s29, %s1069_s10  ;;  %p1574_p5 = scmp.ne.s32.totalorder %s1569_s30, 0 }
  0xc2   : > { %768 = vmatprep.subr.bf16.mxu0 %v1173_v0  ;;  %s1176_s24 = smov [#allocation14]  }
  0xc3   : > { %773 = vmatpush3.bf16.msra.mxu1 %v772_v26  ;;  %p1071_p10 = pnand %p1070_p6, %p1574_p5  ;;  %s1073_s8 = sshll.u32 %s1176_s24, 4  ;;  %s1074_s8 = int_to_ptr.vmem [resolvable:$false] %s1073_s8 }
  0xc4   : > { %774 = vmatprep.subr.bf16.mxu1 %v1173_v0  ;;  %s1075_s27 = scalar_lea.vmem %s1074_s8, 256  ;;  %p1076_p2 = scmp.lt.s32.totalorder %s1493_s29, %s1074_s8 }
  0xc5   : > { %770 = vmatpush3.bf16.msra.mxu0 %v769_v7  ;;  %p1072_p1 = pneg %p1071_p10  ;;  %p1077_p4 = scmp.lt.s32.totalorder %s1075_s27, %s1069_s10 }
  0xc7   : > { %776 = vmatpush3.bf16.msra.mxu1 %v775_v29  ;;  %p1078_p9 = por %p1077_p4, %p1076_p2 }
  0xc8   : > { %752 = vmatmul.mubr.msk.f32.vlgmr.msra.gmra.mrb[0].mxu0 %vm371_vm1, %v359_v8 }
  0xc9   : > { %p1079_p8 = pnand %p1078_p9, %p1072_p1 }
 0x19b   : > { %v441_v10 = vpop.f32.mrb[0].mxu0 }
 0x19c   : > { %v442_v11 = vadd.f32 %v724_v9, %v441_v10  ;;  %v753_v12 = vpop.f32.mrb[1].mxu0 }
 0x19e   : > { %v446_v13 = vmul.f32 0.70710677, %v442_v11  ;;  %v445_v15 = vmul.f32 0.5, %v442_v11 }
 0x1a0   : > { %895 = verf.f32 %v446_v13 }
 0x1aa   : > { %v896_v14 = vpop.eup %895 }
 0x1ab   : > { %v448_v16 = vadd.f32 1.0, %v896_v14 }
 0x1ad   : > { %v449_v17 = vmul.f32 %v448_v16, %v445_v15 }
 0x1af   : > { %v450_v18 = vsel %vm371_vm1, %v449_v17, 0.0 }
 0x1b0   : > { %451 = vadd.xlane.f32.xlu0 %v450_v18 }
 0x23d   : > { %v452_v19 = vpop.xlane.xlu0 %451 }
 0x23e   : > { %v454_v20 = vmul.f32 0.03125, %v452_v19 }
 0x240   : > { %v455_v21 = vsub.f32 %v449_v17, %v454_v20 }
 0x242   : > { %v456_v22 = vmul.f32 %v455_v21, %v455_v21 }
 0x244   : > { %v457_v23 = vsel %vm371_vm1, %v456_v22, 0.0 }
 0x245   : > { %458 = vadd.xlane.f32.xlu0 %v457_v23 }
 0x2d2   : > { %v459_v30 = vpop.xlane.xlu0 %458 }
 0x2d3   : > { %v460_v31 = vmul.f32 0.03125, %v459_v30 }
 0x2d5   : > { %v461_v32 = vadd.f32 1e-12, %v460_v31 }
 0x2d7   : > { %897 = vrsqrt.f32 %v461_v32 }
 0x2e1   : > { %v898_v33 = vpop.eup %897 }
 0x2e2   : > { %v463_v35 = vmul.f32 %v898_v33, %v455_v21 }
 0x2e4   : > { %v471_v37 = vmul.f32 %v726_v34, %v463_v35 }
 0x2e6   : > { %v479_v38 = vadd.f32 %v727_v36, %v471_v37 }
 0x2e8   : > { %480 = vst.msk [vmem:[#allocation2] sm:$0xff] %vm371_vm1, %v479_v38 }
 0x2ef   : > { %v481_v39 = vld [vmem:[#allocation2] sm:$0xff] }
 0x2f0   : > { %763 = vmatmul.mubr.msk.f32.vlgmr.msra.gmra.mrb[0].mxu1 %vm371_vm1, %v481_v39 }
 0x3c3   : > { %v556_v40 = vpop.f32.mrb[0].mxu1 }
 0x3c4   : > { %560 = vst [vmem:[%s354_s28] sm:$0xff] %v556_v40  ;;  %v764_v41 = vpop.f32.mrb[1].mxu1 }
 0x3c5   : > { %1082 = shalt.err (!%p1079_p8)
}
 0x3c6   : > { %s1083_s12 = scalar_lea.hbm %s1498_s17, 128  ;;  %s1087_s9 = scalar_lea.hbm %s1551_s6, 256 }
 0x3c7   : > { %p1084_p3 = scmp.ne.s32.totalorder %s1498_s17, %s1083_s12  ;;  %p1088_p0 = scmp.lt.u32.totalorder %s1498_s17, %s1551_s6 }
 0x3c8   : > { %p1089_p11 = scmp.lt.u32.totalorder %s1087_s9, %s1083_s12  ;;  %p1091_p6 = scmp.lt.u32.totalorder %s1083_s12, %s1498_s17 }
 0x3c9   : > { %p1085_p12 = pnand %p1084_p3, %p1574_p5 }
 0x3ca   : > { %p1090_p7 = por %p1089_p11, %p1088_p0 }
 0x3cb   : > { %p1086_p13 = pneg %p1085_p12 }
 0x3cc   : > { %p1092_p10 = por %p1091_p6, %p1090_p7 }
 0x3ce   : > { %p1093_p1 = pnand %p1092_p10, %p1086_p13 }
 0x3d0   : > { %1096 = shalt.err (!%p1093_p1)
}
 0x3d1   : > { %799 = dma.vmem_to_hbm [thread:$0]  (%p1574_p5), %s1493_s29, 128, %s1498_s17, %s562_s20  }
 0x3d2 PF: > { %s588_s11 = sand.u32 1, %s1143_s21   ;;  %p1575_p2 = scmp.ne.s32.totalorder %s1570_s13, 0 }
 0x3d3   : > { %p1576_p4 = scmp.ge.s32.totalorder %s1163_s26, 2  ;;  %s589_s15 = scalar_lea.sflag [#allocation5], %s588_s11 }
 0x3d5   : > { %p822_p9 = pnand %p1576_p4, %p1575_p2 }
 0x3d7   : > { %1138 = dma.done.wait (!%p822_p9), %s589_s15, 128  }
 0x3d8   : > { %1140 = vsyncadd (!%p822_p9), %s589_s15, 4294967168  ;;  %s25_s26 = sadd.s32 1, %s1163_s26   ;;  %s1577_s21 = smov %s1147_s22 }
 0x3d9   : > { %p22_p8 = scmp.ge.s32.totalorder %s25_s26, 4   ;;  %s1578_s22 = smov %s1151_s23 }
 0x3da   : > { %s1579_s23 = smov %s1414_s7  ;;  %s1580_s24 = smov %s1159_s25 }
 0x3db   : > { %s1581_s25 = smov %s1583_s18  ;;  %24 = sbr.rel (!%p22_p8) target bundleno = 11 (0xb), region = 114 }
 0x3e2   :  { %594 = vsyncpa [#allocation4], 1 }
 0x3e3   :  { %596 = vsyncpa [#allocation4 + $0x1], 1 }
 0x3e4   :  { %597 = vsyncpa [#allocation7], 1 }
 0x3e5   :  { %598 = vsyncpa [#allocation10], 1 }
 0x3e6   :  { %599 = vsyncpa [#allocation13], 1 }
 0x3e7   :  { %600 = vsyncpa [#allocation5], 1 }
 0x3e8   :  { %602 = vsyncpa [#allocation5 + $0x1], 1 }

</bundles_post_ra>
